<compile_context>
chip_gen: v7x
topology: tpu7x:2x2x1
jax: 0.10.0
libtpu: 0.0.40
codegen_flags: <defaults>
</compile_context>

<pallas_src>
import functools

import jax
import jax.numpy as jnp
from jax.experimental import pallas as pl
from jax.experimental.pallas import tpu as pltpu


# ----------------------------------------------------------------------------
# per-generation tiling / VMEM helpers
# ----------------------------------------------------------------------------
_VMEM_LIMIT_CACHE = None


def _vmem_limit_bytes():
    """Scoped-VMEM budget: ~3/4 of physical VMEM, capped (v5e/v6e ~96 MiB, v7x 48 MiB)."""
    global _VMEM_LIMIT_CACHE
    if _VMEM_LIMIT_CACHE is None:
        cap = 64 * 1024 * 1024
        try:
            info = pltpu.get_tpu_info()
            cap = int(getattr(info, "vmem_capacity_bytes", cap)) or cap
        except Exception:
            pass
        _VMEM_LIMIT_CACHE = max(32 * 1024 * 1024,
                                min((cap * 3) // 4, 100 * 1024 * 1024))
    return _VMEM_LIMIT_CACHE


def _pick_tile(dim, target):
    """Largest 128-aligned tile <= target that divides dim (falls back to dim)."""
    if dim <= target:
        return dim
    t = (target // 128) * 128
    while t >= 128:
        if dim % t == 0:
            return t
        t -= 128
    return dim


# ----------------------------------------------------------------------------
# Kernel 1: matmul + bias (+ optional fused GELU), full-K resident, no k-loop
# ----------------------------------------------------------------------------
def _matmul_bias_kernel(x_ref, w_ref, b_ref, o_ref, *, activation):
    out = jnp.dot(x_ref[...], w_ref[...],
                  preferred_element_type=jnp.float32) + b_ref[...]
    if activation == "gelu":
        # TODO(synk): HF GTE uses exact erf GELU; tanh approximation is used so the
        # activation lowers to the EUP tanh path on every TPU generation.
        out = jax.nn.gelu(out, approximate=True)
    o_ref[...] = out.astype(o_ref.dtype)


def matmul_bias(x, w, b, *, activation=None, tm=512, tn=512,
                out_dtype=jnp.bfloat16):
    # K (<= hidden/FFN dim) fits in VMEM for these model sizes, so the K grid axis,
    # f32 accumulator scratch and init/finalize phases are eliminated entirely.
    M, K = x.shape
    _, N = w.shape
    tm = _pick_tile(M, tm)
    tn = _pick_tile(N, tn)
    grid = (M // tm, N // tn)
    return pl.pallas_call(
        functools.partial(_matmul_bias_kernel, activation=activation),
        grid=grid,
        in_specs=[
            pl.BlockSpec((tm, K), lambda i, j: (i, 0)),
            pl.BlockSpec((K, tn), lambda i, j: (0, j)),
            pl.BlockSpec((1, tn), lambda i, j: (0, j)),
        ],
        out_specs=pl.BlockSpec((tm, tn), lambda i, j: (i, j)),
        out_shape=jax.ShapeDtypeStruct((M, N), out_dtype),
        compiler_params=pltpu.CompilerParams(
            dimension_semantics=("parallel", "parallel"),
            vmem_limit_bytes=_vmem_limit_bytes(),
        ),
    )(x, w, b)


# ----------------------------------------------------------------------------
# Kernel 2: matmul + bias + residual add + LayerNorm epilogue (full-K resident)
# ----------------------------------------------------------------------------
def _matmul_res_ln_kernel(x_ref, w_ref, b_ref, res_ref, g_ref, bb_ref,
                          o_ref, *, eps, inv_n):
    h = jnp.dot(x_ref[...], w_ref[...], preferred_element_type=jnp.float32)
    h = h + b_ref[...] + res_ref[...].astype(jnp.float32)
    # one-pass mean / variance: single pair of cross-lane reductions
    s1 = jnp.sum(h, axis=-1, keepdims=True)
    s2 = jnp.sum(h * h, axis=-1, keepdims=True)
    mu = s1 * inv_n
    var = jnp.maximum(s2 * inv_n - mu * mu, 0.0)
    y = (h - mu) * jax.lax.rsqrt(var + eps)
    o_ref[...] = (y * g_ref[...] + bb_ref[...]).astype(o_ref.dtype)


def matmul_bias_residual_layernorm(x, w, b, res, gamma, beta, *, eps=1e-12,
                                   tm=512, out_dtype=jnp.bfloat16):
    # LayerNorm reduces over the whole hidden dim, so N is kept un-tiled (H<=1024).
    M, K = x.shape
    _, N = w.shape
    tm = _pick_tile(M, tm)
    grid = (M // tm,)
    return pl.pallas_call(
        functools.partial(_matmul_res_ln_kernel, eps=eps, inv_n=1.0 / N),
        grid=grid,
        in_specs=[
            pl.BlockSpec((tm, K), lambda i: (i, 0)),
            pl.BlockSpec((K, N), lambda i: (0, 0)),
            pl.BlockSpec((1, N), lambda i: (0, 0)),
            pl.BlockSpec((tm, N), lambda i: (i, 0)),
            pl.BlockSpec((1, N), lambda i: (0, 0)),
            pl.BlockSpec((1, N), lambda i: (0, 0)),
        ],
        out_specs=pl.BlockSpec((tm, N), lambda i: (i, 0)),
        out_shape=jax.ShapeDtypeStruct((M, N), out_dtype),
        compiler_params=pltpu.CompilerParams(
            dimension_semantics=("parallel",),
            vmem_limit_bytes=_vmem_limit_bytes(),
        ),
    )(x, w, b, res, gamma, beta)


# ----------------------------------------------------------------------------
# Kernel 3: flash-style attention, head split/merge folded into BlockSpecs
# ----------------------------------------------------------------------------
def _flash_attn_kernel(q_ref, k_ref, v_ref, bias_ref, o_ref,
                       m_sc, l_sc, acc_sc):
    kv = pl.program_id(2)

    @pl.when(kv == 0)
    def _():
        m_sc[...] = jnp.full_like(m_sc, -jnp.inf)
        l_sc[...] = jnp.zeros_like(l_sc)
        acc_sc[...] = jnp.zeros_like(acc_sc)

    q = q_ref[0]          # [S, dh]   (1/sqrt(dh) already folded into Q weights)
    k = k_ref[0]          # [tkv, dh]
    v = v_ref[0]          # [tkv, dh]
    bias = bias_ref[0]    # [1, tkv]  additive mask

    # q @ k^T without an explicit transpose: contract on the dh axis of both.
    s = jax.lax.dot_general(q, k, (((1,), (1,)), ((), ())),
                            preferred_element_type=jnp.float32) + bias

    m_new = jnp.maximum(m_sc[...], jnp.max(s, axis=-1, keepdims=True))
    alpha = jnp.exp(m_sc[...] - m_new)
    p = jnp.exp(s - m_new)
    l_sc[...] = alpha * l_sc[...] + jnp.sum(p, axis=-1, keepdims=True)
    acc_sc[...] = alpha * acc_sc[...] + jnp.dot(
        p.astype(v.dtype), v, preferred_element_type=jnp.float32)
    m_sc[...] = m_new

    @pl.when(kv == pl.num_programs(2) - 1)
    def _():
        # exact division: runs once per (b, h), negligible cost, full precision
        o_ref[0] = (acc_sc[...] / l_sc[...]).astype(o_ref.dtype)


def attention(qkv, bias, n_heads, *, tkv=256, out_dtype=jnp.bfloat16):
    # qkv: [B, S, 3H] (fused projection output), bias: [B, 1, S] additive (0 / -1e9)
    B, S, H3 = qkv.shape
    H = H3 // 3
    dh = H // n_heads
    nH = n_heads
    tkv = _pick_tile(S, tkv)
    # TODO(synk): production GTE dh=64 violates the 128-lane block constraint for the
    # (., ., dh) head slabs; process 2 heads per grid step or pack dh to 128 lanes then.

    # Head selection expressed in index maps: head h of Q/K/V is a dh-wide column
    # slab of the [.., 3H] array (block index h / nH+h / 2nH+h).  Output writes the
    # head back into its [.., H] column slab, i.e. the merge transpose is free.
    q_spec = pl.BlockSpec((1, S, dh), lambda b, h, kv: (b, 0, h))
    k_spec = pl.BlockSpec((1, tkv, dh), lambda b, h, kv: (b, kv, nH + h))
    v_spec = pl.BlockSpec((1, tkv, dh), lambda b, h, kv: (b, kv, 2 * nH + h))
    bias_spec = pl.BlockSpec((1, 1, tkv), lambda b, h, kv: (b, 0, kv))
    o_spec = pl.BlockSpec((1, S, dh), lambda b, h, kv: (b, 0, h))

    return pl.pallas_call(
        _flash_attn_kernel,
        grid=(B, nH, S // tkv),
        in_specs=[q_spec, k_spec, v_spec, bias_spec],
        out_specs=o_spec,
        out_shape=jax.ShapeDtypeStruct((B, S, H), out_dtype),
        scratch_shapes=[
            pltpu.VMEM((S, 1), jnp.float32),    # running max
            pltpu.VMEM((S, 1), jnp.float32),    # running denom
            pltpu.VMEM((S, dh), jnp.float32),   # running accumulator
        ],
        compiler_params=pltpu.CompilerParams(
            dimension_semantics=("parallel", "parallel", "arbitrary"),
            vmem_limit_bytes=_vmem_limit_bytes(),
        ),
    )(qkv, qkv, qkv, bias)


# ----------------------------------------------------------------------------
# Kernel 4: final CLS L2 normalization (matches F.normalize(p=2, dim=1))
# ----------------------------------------------------------------------------
def _l2_normalize_kernel(x_ref, o_ref):
    x = x_ref[...].astype(jnp.float32)
    nrm = jnp.sqrt(jnp.sum(x * x, axis=-1, keepdims=True))
    o_ref[...] = x / jnp.maximum(nrm, 1e-12)


def cls_l2_normalize(cls):
    B, H = cls.shape
    return pl.pallas_call(
        _l2_normalize_kernel,
        out_shape=jax.ShapeDtypeStruct((B, H), jnp.float32),
    )(cls)


# ----------------------------------------------------------------------------
# model glue (parameter setup, embedding gather, layer loop)
# ----------------------------------------------------------------------------
def init_params(key, vocab, hidden, ffn_dim, n_layers, n_heads,
                dtype=jnp.bfloat16):
    dh = hidden // n_heads
    q_scale = 1.0 / (dh ** 0.5)   # folded into Q weight columns (no in-kernel rescale)

    def nrm(k, shape, scale=1.0):
        return (scale * 0.02 * jax.random.normal(k, shape, jnp.float32)).astype(dtype)

    def row(v):   # pre-cast f32 row vectors once; no per-layer reshape/astype ops
        return v.reshape(1, -1).astype(jnp.float32)

    keys = jax.random.split(key, 1 + n_layers)
    params = {"emb": nrm(keys[0], (vocab, hidden)), "layers": []}
    for li in range(n_layers):
        ks = jax.random.split(keys[1 + li], 6)
        layer = {
            # fused QKV projection: single [H, 3H] bf16 weight + [1, 3H] f32 bias
            "w_qkv": jnp.concatenate(
                [nrm(ks[0], (hidden, hidden), q_scale),
                 nrm(ks[1], (hidden, hidden)),
                 nrm(ks[2], (hidden, hidden))], axis=1),
            "b_qkv": row(jnp.zeros((3 * hidden,), jnp.float32)),
            "wo": nrm(ks[3], (hidden, hidden)),
            "bo": row(jnp.zeros((hidden,), jnp.float32)),
            "ln1_g": row(jnp.ones((hidden,), jnp.float32)),
            "ln1_b": row(jnp.zeros((hidden,), jnp.float32)),
            "w1": nrm(ks[4], (hidden, ffn_dim)),
            "b1": row(jnp.zeros((ffn_dim,), jnp.float32)),
            "w2": nrm(ks[5], (ffn_dim, hidden)),
            "b2": row(jnp.zeros((hidden,), jnp.float32)),
            "ln2_g": row(jnp.ones((hidden,), jnp.float32)),
            "ln2_b": row(jnp.zeros((hidden,), jnp.float32)),
        }
        params["layers"].append(layer)
    return params


def encoder_forward(params, input_ids, attention_mask, n_heads):
    # TODO(synk): the HF tokenizer, pretrained GTE checkpoint (RoPE attention) and
    # the length-sorted batching logic of the PyTorch module have no kernel
    # equivalent; this is a deterministic synthetic encoder with the same forward
    # structure (embed -> L x [attn, Add&LN, FFN, Add&LN] -> CLS -> L2 normalize).
    B, S = input_ids.shape
    H = params["emb"].shape[1]

    # Embedding gather stays in XLA (tiny, irregular access).
    x = params["emb"][input_ids].reshape(B * S, H)                     # [B*S, H] bf16

    bias = ((1.0 - attention_mask.astype(jnp.float32)) * -1e9).reshape(B, 1, S)

    for layer in params["layers"]:
        # fused QKV projection: one MXU pass over x, lane-dense [B*S, 3H] output
        qkv = matmul_bias(x, layer["w_qkv"], layer["b_qkv"])           # [B*S, 3H]
        attn = attention(qkv.reshape(B, S, 3 * H), bias, n_heads)      # [B, S, H]
        # output projection + residual + LayerNorm fused into one kernel
        x = matmul_bias_residual_layernorm(
            attn.reshape(B * S, H), layer["wo"], layer["bo"],
            x, layer["ln1_g"], layer["ln1_b"])
        # FFN: matmul + GELU fused, then matmul + residual + LayerNorm fused
        h = matmul_bias(x, layer["w1"], layer["b1"], activation="gelu")
        x = matmul_bias_residual_layernorm(
            h, layer["w2"], layer["b2"],
            x, layer["ln2_g"], layer["ln2_b"])

    cls = x.reshape(B, S, H)[:, 0, :]                                  # last_hidden_state[:, 0]
    return cls_l2_normalize(cls)                                       # F.normalize(p=2, dim=1)


# ----------------------------------------------------------------------------
# main
# ----------------------------------------------------------------------------
if __name__ == "__main__":
    # small but tile-friendly shapes (all tiled dims multiples of 128)
    B, S, H, NH, FFN, VOCAB, LAYERS = 2, 128, 256, 2, 512, 128, 2

    key = jax.random.PRNGKey(0)
    k_ids, k_params = jax.random.split(key)

    params = init_params(k_params, VOCAB, H, FFN, LAYERS, NH)
    input_ids = jax.random.randint(k_ids, (B, S), 0, VOCAB, dtype=jnp.int32)
    attention_mask = jnp.ones((B, S), dtype=jnp.int32)
    attention_mask = attention_mask.at[1, 96:].set(0)                  # simulate padding

    out = jax.block_until_ready(
        encoder_forward(params, input_ids, attention_mask, NH))

    assert out.shape == (B, H)
    assert bool(jnp.all(jnp.isfinite(out)))
    # rows should be unit-norm after L2 normalization
    norms = jnp.sqrt(jnp.sum(out * out, axis=-1))
    assert bool(jnp.all(jnp.abs(norms - 1.0) < 1e-4))
    print("KERNEL_OK")
</pallas_src>

<mosaic_0001>
module attributes {stable_mosaic.version = 11 : i64} {
  func.func @_matmul_bias_kernel(%arg0: i32, %arg1: i32, %arg2: memref<256x256xbf16, #tpu.memory_space<vmem>>, %arg3: memref<256x384xbf16, #tpu.memory_space<vmem>>, %arg4: memref<1x384xf32, #tpu.memory_space<vmem>>, %arg5: memref<256x384xbf16, #tpu.memory_space<vmem>>) attributes {dimension_semantics = [#tpu.dimension_semantics<parallel>, #tpu.dimension_semantics<parallel>], iteration_bounds = array<i64: 1, 2>, scalar_prefetch = 0 : i64, scratch_operands = 0 : i64, tpu.core_type = #tpu.core_type<tc>, window_params = [{transform_indices = @transform_0, window_bounds = array<i64: 256, 256>}, {transform_indices = @transform_1, window_bounds = array<i64: 256, 384>}, {transform_indices = @transform_2, window_bounds = array<i64: 1, 384>}, {transform_indices = @transform_3, window_bounds = array<i64: 256, 384>}]} {
    %c0 = arith.constant 0 : index
    %c0_0 = arith.constant 0 : index
    %0 = vector.load %arg2[%c0, %c0_0] : memref<256x256xbf16, #tpu.memory_space<vmem>>, vector<256x256xbf16>
    %c0_1 = arith.constant 0 : index
    %c0_2 = arith.constant 0 : index
    %1 = vector.load %arg3[%c0_1, %c0_2] : memref<256x384xbf16, #tpu.memory_space<vmem>>, vector<256x384xbf16>
    %cst = arith.constant dense<0.000000e+00> : vector<256x384xf32>
    %2 = tpu.matmul %0, %1, %cst {dimension_numbers = #tpu.dot_dimension_numbers<[1], [0], [0], [1], [0, 0, 1, 1], [], []>} : vector<256x256xbf16>, vector<256x384xbf16>, vector<256x384xf32> -> vector<256x384xf32>
    %c0_3 = arith.constant 0 : index
    %c0_4 = arith.constant 0 : index
    %3 = vector.load %arg4[%c0_3, %c0_4] : memref<1x384xf32, #tpu.memory_space<vmem>>, vector<1x384xf32>
    %4 = vector.broadcast %3 : vector<1x384xf32> to vector<256x384xf32>
    %5 = arith.addf %2, %4 : vector<256x384xf32>
    %6 = arith.truncf %5 : vector<256x384xf32> to vector<256x384xbf16>
    %c0_5 = arith.constant 0 : index
    %c0_6 = arith.constant 0 : index
    %7 = vector.load %arg5[%c0_5, %c0_6] : memref<256x384xbf16, #tpu.memory_space<vmem>>, vector<256x384xbf16>
    tpu.vector_store %arg5[%c0_5, %c0_6], %6 {strides = array<i32>} : memref<256x384xbf16, #tpu.memory_space<vmem>>, vector<256x384xbf16>,
    return
  }
  func.func @transform_0(%arg0: i32, %arg1: i32) -> (i32, i32) {
    %c0_i32 = arith.constant 0 : i32
    %c0_i32_0 = arith.constant 0 : i32
    return %arg0, %c0_i32 : i32, i32
  }
  func.func @transform_1(%arg0: i32, %arg1: i32) -> (i32, i32) {
    %c0_i32 = arith.constant 0 : i32
    %c0_i32_0 = arith.constant 0 : i32
    return %c0_i32, %arg1 : i32, i32
  }
  func.func @transform_2(%arg0: i32, %arg1: i32) -> (i32, i32) {
    %c0_i32 = arith.constant 0 : i32
    %c0_i32_0 = arith.constant 0 : i32
    return %c0_i32, %arg1 : i32, i32
  }
  func.func @transform_3(%arg0: i32, %arg1: i32) -> (i32, i32) {
    %c0_i32 = arith.constant 0 : i32
    return %arg0, %arg1 : i32, i32
  }
}

</mosaic_0001>

<bundles_post_ra>
// kernel: tpu_custom_call.1
= control target key start
LH: loop header
LB: loop body
LE: loop exit
PB: predicated region body
PF: predicated region fallthrough
CT: control target
= control target key end

     0   :  { %8 = vsyncpa [#allocation3], 0  ;;  %s2802_s0 = inlined_call_operand.hbm [shape: bf16[256,256], index: 0, kind: input, shape index: {}]   ;;  %s2803_s1 = inlined_call_operand.hbm [shape: bf16[256,768], index: 1, kind: input, shape index: {}]   ;;  %s2804_s2 = inlined_call_operand.vmem [shape: f32[1,768], index: 2, kind: input, shape index: {}]   ;;  %s2805_s3 = inlined_call_operand.hbm [shape: bf16[256,768], index: 3, kind: output, shape index: {}]  }
   0x1   :  { %9 = vsyncpa [#allocation6], 0 }
   0x2   :  { %11 = vsyncpa [#allocation6 + $0x1], 0 }
   0x3   :  { %12 = vsyncpa [#allocation4], 0 }
   0x4   :  { %14 = vsyncpa [#allocation4 + $0x1], 0  ;;  %s2347_s12 = smov 0   ;;  %s2349_s13 = smov 0  }
   0x5   :  { %s2351_s14 = smov 0   ;;  %s2353_s15 = smov 0  }
   0x6   :  { %s2355_s16 = smov 0   ;;  %s2357_s17 = smov 0  }
   0x7 LB: > { %s1642_s18 = sadd.s32 4294967295, %s2314_s17   ;;  %s1643_s19 = sadd.s32 4294967294, %s2314_s17   ;;  %s2314_s17 = sphi %s2357_s17, %s20_s17   ;;  %s2310_s16 = sphi %s2355_s16, %s2834_s16   ;;  %s2306_s15 = sphi %s2353_s15, %s2833_s15   ;;  %s2302_s14 = sphi %s2351_s14, %s2832_s14   ;;  %s2298_s13 = sphi %s2349_s13, %s2831_s13   ;;  %s2294_s12 = sphi %s2347_s12, %s2830_s12  }
   0x8   : > { %p72_p0 = scmp.ne.s32.totalorder %s2302_s14, %s2298_s13  ;;  %p73_p1 = scmp.eq.s32.totalorder %s2314_s17, 0 }
   0x9   : > { %p78_p2 = scmp.ne.s32.totalorder %s2298_s13, %s2294_s12  ;;  %p2385_p3 = scmp.eq.s32.totalorder %s1642_s18, 0 }
   0xa   : > { %p130_p4 = scmp.eq.s32.totalorder %s1642_s18, 1  ;;  %p2389_p5 = por %p73_p1, %p72_p0 }
   0xb   : > { %s2812_s21 = scalar_select %p2385_p3, 1, 0 }
   0xc   : > { %p136_p6 = scmp.eq.s32.totalorder %s1643_s19, 1  ;;  %p2395_p7 = por %p2385_p3, %p78_p2 }
   0xd   : > { %p2399_p8 = por %p130_p4, %p72_p0  ;;  %p1644_p10 = scmp.ge.s32.totalorder %s2314_s17, 1 }
   0xe   : > { %s2814_s23 = scalar_select %p2395_p7, 1, 0 }
   0xf   : > { %s2815_s24 = scalar_select %p2399_p8, 1, 0 }
  0x10   : > { %p2403_p9 = por %p136_p6, %p78_p2  ;;  %p143_p11 = scmp.lt.s32.totalorder %s2314_s17, 3 }
  0x11   : > { %s2316_s27 = smov [#allocation2]   ;;  %p1998_p1 = scmp.lt.s32.totalorder %s2314_s17, 2 }
  0x12   : > { %s2816_s25 = scalar_select %p2403_p9, 1, 0 }
  0x13   : > { %p2409_p12 = pnand %p1644_p10, %p143_p11  ;;  %s159_s28 = sshll.u32 %s2316_s27, 4  ;;  %s2413_s28 = int_to_ptr.vmem [resolvable:$true] %s159_s28 }
  0x14   : > { %p2427_p4 = pnand %p1998_p1, %p2389_p5  ;;  %s29_s4 = sadd.s32 1, %s2310_s16 }
  0x15   : > { %s2817_s26 = scalar_select %p2409_p12, 1, 0 }
  0x16   : > { %p1985_p13 = pneg %p2409_p12  ;;  %p2432_p6 = scmp.ge.s32.totalorder %s29_s4, 2 }
  0x17   : > { %s2819_s30 = scalar_select %p2427_p4, 1, 0 }
  0x18   : > { %p2421_p2 = pnand %p1985_p13, %p2385_p3  ;;  %s2170_s8 = scalar_lea.hbm %s2802_s0, 4096 }
  0x19   : > { %s2820_s5 = scalar_select %p2432_p6, 1, 0 }
  0x1a   : > { %p2171_p10 = scmp.ne.s32.totalorder %s2802_s0, %s2170_s8  ;;  %p2172_p11 = pneg %p2421_p2 }
  0x1b   : > { %p2177_p1 = scmp.lt.u32.totalorder %s2170_s8, %s2802_s0 }
  0x1c   : > { %p2173_p13 = pnand %p2172_p11, %p2171_p10 }
  0x1e   : > { %p2174_p5 = pneg %p2173_p13 }
  0x20   : > { %p2179_p0 = pnand %p2177_p1, %p2174_p5 }
  0x22   : > { %2182 = shalt.err (!%p2179_p0)
}
  0x23   : > { %s2183_s19 = scalar_lea.vmem %s2413_s28, 4096  ;;  %p2191_p3 = scmp.lt.s32.totalorder %s2413_s28, %s2413_s28 }
  0x24   : > { %p2184_p9 = scmp.ne.s32.totalorder %s2413_s28, %s2183_s19  ;;  %p2192_p12 = scmp.lt.s32.totalorder %s2183_s19, %s2183_s19 }
  0x26   : > { %p2186_p8 = pnand %p2184_p9, %p2172_p11  ;;  %p2193_p4 = por %p2192_p12, %p2191_p3 }
  0x28   : > { %p2187_p7 = pneg %p2186_p8 }
  0x2a   : > { %p2194_p6 = pnand %p2193_p4, %p2187_p7 }
  0x2c   : > { %2197 = shalt.err (!%p2194_p6)
}
  0x2d   : > { %s2317_s22 = smov 128   ;;  %s2318_s27 = smov 8  }
  0x2e   : > { %1988 = dma.hbm_to_vmem [thread:$0]  (!%p2421_p2), %s2802_s0, 4096, %s2413_s28, [#allocation3], %s2317_s22, %s2317_s22, %s2318_s27  }
  0x2f   : > { %s173_s8 = sand.u32 1, %s2302_s14   ;;  %p2821_p3 = scmp.ne.s32.totalorder %s2820_s5, 0 }
  0x30   : > { %s1975_s9 = smul.u32 384, %s173_s8  ;;  %s2822_s22 = sadd.s32 1, %s2302_s14 }
  0x31   : > { %s2836_s4 = smov (%p2821_p3, %s29_s4), 0  ;;  %s1797_s11 = smul.u32 192, %s2310_s16 }
  0x32   : > { %s62_s10 = ssub.s32 %s2310_s16, %s2836_s4  ;;  %s177_s28 = scalar_lea.vmem [#allocation5], %s1975_s9 }
  0x33   : > { %p63_p7 = scmp.eq.s32.totalorder %s62_s10, 0  ;;  %s2468_s20 = scalar_lea.hbm %s2803_s1, %s1797_s11 }
  0x34   : > { %s184_s29 = sshll.u32 %s177_s28, 4  ;;  %s2477_s27 = scalar_lea.sflag [#allocation6], %s173_s8  ;;  %s2475_s29 = int_to_ptr.vmem [resolvable:$true] %s184_s29 }
  0x35   : > { %s2473_s5 = scalar_select %p63_p7, %s2302_s14, %s2822_s22  }
  0x36   : > { %s2198_s6 = scalar_lea.hbm %s2468_s20, 6144  ;;  %p2823_p9 = scmp.ne.s32.totalorder %s2819_s30, 0 }
  0x37   : > { %p2199_p8 = scmp.ne.s32.totalorder %s2468_s20, %s2198_s6  ;;  %s2203_s9 = scalar_lea.hbm %s2803_s1, 12288 }
  0x38   : > { %p2200_p12 = pneg %p2823_p9  ;;  %p2204_p4 = scmp.lt.u32.totalorder %s2468_s20, %s2803_s1 }
  0x39   : > { %p2205_p6 = scmp.lt.u32.totalorder %s2203_s9, %s2198_s6  ;;  %p2207_p11 = scmp.lt.u32.totalorder %s2198_s6, %s2468_s20 }
  0x3a   : > { %p2201_p0 = pnand %p2200_p12, %p2199_p8 }
  0x3b   : > { %p2206_p10 = por %p2205_p6, %p2204_p4 }
  0x3c   : > { %p2202_p2 = pneg %p2201_p0 }
  0x3d   : > { %p2208_p13 = por %p2207_p11, %p2206_p10 }
  0x3f   : > { %p2209_p5 = pnand %p2208_p13, %p2202_p2 }
  0x41   : > { %2212 = shalt.err (!%p2209_p5)
}
  0x42   : > { %s2213_s8 = scalar_lea.vmem %s2475_s29, 6144  ;;  %s2319_s19 = smov [#allocation5]  }
  0x43   : > { %p2214_p1 = scmp.ne.s32.totalorder %s2475_s29, %s2213_s8  ;;  %s2218_s28 = sshll.u32 %s2319_s19, 4  ;;  %s2219_s28 = int_to_ptr.vmem [resolvable:$false] %s2218_s28 }
  0x44   : > { %s2220_s22 = scalar_lea.vmem %s2219_s28, 12288  ;;  %p2221_p8 = scmp.lt.s32.totalorder %s2475_s29, %s2219_s28 }
  0x45   : > { %p2216_p3 = pnand %p2214_p1, %p2200_p12  ;;  %p2222_p0 = scmp.lt.s32.totalorder %s2220_s22, %s2213_s8 }
  0x47   : > { %p2217_p7 = pneg %p2216_p3  ;;  %p2223_p4 = por %p2222_p0, %p2221_p8 }
  0x49   : > { %p2224_p6 = pnand %p2223_p4, %p2217_p7 }
  0x4b   : > { %2227 = shalt.err (!%p2224_p6)
}
  0x4c   : > { %s2320_s6 = smov 384   ;;  %s2321_s7 = smov 192  }
  0x4d   : > { %s2322_s10 = smov 12   ;;  %p2824_p12 = scmp.ne.s32.totalorder %s2817_s26, 0 }
  0x4e   : > { %1992 = dma.hbm_to_vmem [thread:$0]  (!%p2823_p9), %s2468_s20, 6144, %s2475_s29, %s2477_s27, %s2320_s6, %s2321_s7, %s2322_s10  }
  0x4f   : > { %204 = sbr.rel (%p2824_p12) target bundleno = 512 (0x200), region = 32  ;;  %p2825_p2 = scmp.ne.s32.totalorder (!%p2824_p12), %s2812_s21, 0 }
  0x56   : > { %2281 = dma.done.wait (%p2825_p2), [#allocation3], 4096  }
  0x57   : > { %2283 = vsyncadd (%p2825_p2), [#allocation3], 4294963200  ;;  %s2512_s9 = sand.u32 1, %s2298_s13   ;;  %p2826_p9 = scmp.ne.s32.totalorder %s2814_s23, 0 }
  0x58   : > { %s1976_s11 = smul.u32 384, %s2512_s9  ;;  %s211_s18 = scalar_lea.sflag [#allocation6], %s2512_s9 }
  0x5a   : > { %s2518_s20 = scalar_lea.vmem [#allocation5], %s1976_s11 }
  0x5b   : > { %2285 = dma.done.wait (%p2826_p9), %s211_s18, 6144  }
  0x5c   : > { %2287 = vsyncadd (%p2826_p9), %s211_s18, 4294961152  ;;  %v2058_v0 = vld [vmem:[%s2518_s20 + $0x4] ss:$12 sps:$4 sm:$0xff]   ;;  %v2060_v1 = vld [vmem:[%s2518_s20] ss:$12 sps:$4 sm:$0xff]   ;;  %s243_s21 = smul.u32 3, %s2306_s15 }
  0x5d   : > { %780 = vmatprep.subr.bf16.mxu0 %v2058_v0  ;;  %v2061_v2 = vld [vmem:[%s2518_s20 + $0x1c] ss:$12 sps:$4 sm:$0xff]   ;;  %v2063_v3 = vld [vmem:[%s2518_s20 + $0x18] ss:$12 sps:$4 sm:$0xff]   ;;  %v2064_v4 = vld [vmem:[%s2518_s20 + $0x34] ss:$12 sps:$4 sm:$0xff]  }
  0x5e   : > { %781 = vmatpush1.bf16.msra.mxu0 %v2060_v1  ;;  %v2066_v5 = vld [vmem:[%s2518_s20 + $0x30] ss:$12 sps:$4 sm:$0xff]   ;;  %v2067_v6 = vld [vmem:[%s2518_s20 + $0x4c] ss:$12 sps:$4 sm:$0xff]   ;;  %v2079_v7 = vld [vmem:[%s2518_s20 + $0xc8] ss:$12 sps:$4 sm:$0xff]  }
  0x5f   : > { %782 = vmatprep.subr.bf16.mxu0 %v2061_v2  ;;  %v2069_v8 = vld [vmem:[%s2518_s20 + $0x48] ss:$12 sps:$4 sm:$0xff]   ;;  %v2070_v9 = vld [vmem:[%s2518_s20 + $0x64] ss:$12 sps:$4 sm:$0xff]   ;;  %1863 = vmatprep.subr.bf16.mxu1 %v2079_v7  ;;  %v2084_v11 = vld [vmem:[%s2518_s20 + $0xe0] ss:$12 sps:$4 sm:$0xff]  }
  0x60   : > { %v2082_v10 = vld [vmem:[%s2518_s20 + $0x8] ss:$12 sps:$4 sm:$0xff]   ;;  %v2072_v12 = vld [vmem:[%s2518_s20 + $0x60] ss:$12 sps:$4 sm:$0xff]   ;;  %v2089_v15 = vld [vmem:[%s2518_s20 + $0xf8] ss:$12 sps:$4 sm:$0xff]  }
  0x61   : > { %1864 = vmatpush3.bf16.msra.mxu1 %v2082_v10  ;;  %v2073_v13 = vld [vmem:[%s2518_s20 + $0x7c] ss:$12 sps:$4 sm:$0xff]   ;;  %v2087_v14 = vld [vmem:[%s2518_s20 + $0x20] ss:$12 sps:$4 sm:$0xff]   ;;  %v2075_v16 = vld [vmem:[%s2518_s20 + $0x78] ss:$12 sps:$4 sm:$0xff]  }
  0x62   : > { %783 = vmatpush1.bf16.msra.mxu0 %v2063_v3  ;;  %1865 = vmatprep.subr.bf16.mxu1 %v2084_v11  ;;  %v2092_v17 = vld [vmem:[%s2518_s20 + $0x38] ss:$12 sps:$4 sm:$0xff]   ;;  %v2076_v18 = vld [vmem:[%s2518_s20 + $0x94] ss:$12 sps:$4 sm:$0xff]   ;;  %v2094_v19 = vld [vmem:[%s2518_s20 + $0x110] ss:$12 sps:$4 sm:$0xff]  }
  0x63   : > { %784 = vmatprep.subr.bf16.mxu0 %v2064_v4  ;;  %v2078_v20 = vld [vmem:[%s2518_s20 + $0x90] ss:$12 sps:$4 sm:$0xff]   ;;  %v2099_v22 = vld [vmem:[%s2518_s20 + $0x128] ss:$12 sps:$4 sm:$0xff]   ;;  %v2080_v23 = vld [vmem:[%s2518_s20 + $0xac] ss:$12 sps:$4 sm:$0xff]  }
  0x64   : > { %v2097_v21 = vld [vmem:[%s2518_s20 + $0x50] ss:$12 sps:$4 sm:$0xff]   ;;  %v2083_v24 = vld [vmem:[%s2518_s20 + $0xa8] ss:$12 sps:$4 sm:$0xff]   ;;  %v2104_v26 = vld [vmem:[%s2518_s20 + $0x140] ss:$12 sps:$4 sm:$0xff]  }
  0x65   : > { %1866 = vmatpush3.bf16.msra.mxu1 %v2087_v14  ;;  %v2102_v25 = vld [vmem:[%s2518_s20 + $0x68] ss:$12 sps:$4 sm:$0xff]   ;;  %v2085_v27 = vld [vmem:[%s2518_s20 + $0xc4] ss:$12 sps:$4 sm:$0xff]   ;;  %v2088_v28 = vld [vmem:[%s2518_s20 + $0xc0] ss:$12 sps:$4 sm:$0xff]  }
  0x66   : > { %785 = vmatpush1.bf16.msra.mxu0 %v2066_v5  ;;  %1867 = vmatprep.subr.bf16.mxu1 %v2089_v15  ;;  %v2107_v29 = vld [vmem:[%s2518_s20 + $0x80] ss:$12 sps:$4 sm:$0xff]   ;;  %v2109_v30 = vld [vmem:[%s2518_s20 + $0x158] ss:$12 sps:$4 sm:$0xff]   ;;  %v2090_v31 = vld [vmem:[%s2518_s20 + $0xdc] ss:$12 sps:$4 sm:$0xff]  }
  0x67   : > { %786 = vmatprep.subr.bf16.mxu0 %v2067_v6  ;;  %v2112_v32 = vld [vmem:[%s2518_s20 + $0x98] ss:$12 sps:$4 sm:$0xff]   ;;  %v2114_v34 = vld [vmem:[%s2518_s20 + $0x170] ss:$12 sps:$4 sm:$0xff]   ;;  %v2095_v35 = vld [vmem:[%s2518_s20 + $0xf4] ss:$12 sps:$4 sm:$0xff]  }
  0x68   : > { %v2093_v33 = vld [vmem:[%s2518_s20 + $0xd8] ss:$12 sps:$4 sm:$0xff]   ;;  %v2117_v37 = vld [vmem:[%s2518_s20 + $0xb0] ss:$12 sps:$4 sm:$0xff]   ;;  %v2119_v40 = vld [vmem:[#allocation2] ss:$8 sps:$4 sm:$0xff]  }
  0x69   : > { %1868 = vmatpush3.bf16.msra.mxu1 %v2092_v17  ;;  %v2121_v36 = vld [vmem:[#allocation2 + $0x4] ss:$8 sps:$4 sm:$0xff]   ;;  %v2098_v38 = vld [vmem:[%s2518_s20 + $0xf0] ss:$12 sps:$4 sm:$0xff]   ;;  %v2103_v42 = vld [vmem:[%s2518_s20 + $0x108] ss:$12 sps:$4 sm:$0xff]  }
  0x6a   : > { %787 = vmatpush1.bf16.msra.mxu0 %v2069_v8  ;;  %1869 = vmatprep.subr.bf16.mxu1 %v2094_v19  ;;  %v2100_v39 = vld [vmem:[%s2518_s20 + $0x10c] ss:$12 sps:$4 sm:$0xff]   ;;  %v2125_v41 = vld [vmem:[#allocation2 + $0x14] ss:$8 sps:$4 sm:$0xff]   ;;  %v2105_v43 = vld [vmem:[%s2518_s20 + $0x124] ss:$12 sps:$4 sm:$0xff]  }
  0x6b   : > { %788 = vmatprep.subr.bf16.mxu0 %v2070_v9  ;;  %1005 = vmatprep.mubr.bf16.mxu1 %v2121_v36  ;;  %v2108_v44 = vld [vmem:[%s2518_s20 + $0x120] ss:$12 sps:$4 sm:$0xff]   ;;  %v2110_v45 = vld [vmem:[%s2518_s20 + $0x13c] ss:$12 sps:$4 sm:$0xff]   ;;  %v2127_v46 = vld [vmem:[#allocation2 + $0x10] ss:$8 sps:$4 sm:$0xff]  }
  0x6c   : > { %812 = vmatprep.mubr.bf16.mxu0 %v2121_v36  ;;  %v2128_v47 = vld [vmem:[#allocation2 + $0x24] ss:$8 sps:$4 sm:$0xff]   ;;  %v2115_v49 = vld [vmem:[%s2518_s20 + $0x154] ss:$12 sps:$4 sm:$0xff]   ;;  %v2118_v50 = vld [vmem:[%s2518_s20 + $0x150] ss:$12 sps:$4 sm:$0xff]  }
  0x6d   : > { %1870 = vmatpush3.bf16.msra.mxu1 %v2097_v21  ;;  %v2113_v48 = vld [vmem:[%s2518_s20 + $0x138] ss:$12 sps:$4 sm:$0xff]   ;;  %v2130_v52 = vld [vmem:[#allocation2 + $0x20] ss:$8 sps:$4 sm:$0xff]   ;;  %v2131_v53 = vld [vmem:[#allocation2 + $0x34] ss:$8 sps:$4 sm:$0xff]  }
  0x6e   : > { %789 = vmatpush1.bf16.msra.mxu0 %v2072_v12  ;;  %1871 = vmatprep.subr.bf16.mxu1 %v2099_v22  ;;  %v2122_v51 = vld [vmem:[%s2518_s20 + $0x16c] ss:$12 sps:$4 sm:$0xff]   ;;  %v2124_v54 = vld [vmem:[%s2518_s20 + $0x168] ss:$12 sps:$4 sm:$0xff]   ;;  %p244_p10 = scmp.lt.s32.totalorder %s243_s21, 5  ;;  %s2582_s29 = scalar_lea.vmem [#allocation7], %s1976_s11 }
  0x6f   : > { %790 = vmatprep.subr.bf16.mxu0 %v2073_v13  ;;  %v2133_v55 = vld [vmem:[#allocation2 + $0x30] ss:$8 sps:$4 sm:$0xff]   ;;  %v2134_v56 = vld [vmem:[#allocation2 + $0x44] ss:$8 sps:$4 sm:$0xff]   ;;  %v2136_v57 = vld [vmem:[#allocation2 + $0x40] ss:$8 sps:$4 sm:$0xff]  }
  0x70   : > { %v2137_v58 = vld [vmem:[#allocation2 + $0x54] ss:$8 sps:$4 sm:$0xff]   ;;  %v2139_v59 = vld [vmem:[#allocation2 + $0x50] ss:$8 sps:$4 sm:$0xff]   ;;  %v2140_v60 = vld [vmem:[#allocation2 + $0x64] ss:$8 sps:$4 sm:$0xff]  }
  0x71   : > { %1872 = vmatpush3.bf16.msra.mxu1 %v2102_v25  ;;  %v2142_v61 = vld [vmem:[#allocation2 + $0x60] ss:$8 sps:$4 sm:$0xff]   ;;  %v2143_v62 = vld [vmem:[#allocation2 + $0x74] ss:$8 sps:$4 sm:$0xff]   ;;  %v2145_v63 = vld [vmem:[#allocation2 + $0x70] ss:$8 sps:$4 sm:$0xff]  }
  0x72   : > { %791 = vmatpush1.bf16.msra.mxu0 %v2075_v16  ;;  %1873 = vmatprep.subr.bf16.mxu1 %v2104_v26  ;;  %v2146_v0 = vld [vmem:[#allocation2 + $0x84] ss:$8 sps:$4 sm:$0xff]   ;;  %v2148_v1 = vld [vmem:[#allocation2 + $0x80] ss:$8 sps:$4 sm:$0xff]   ;;  %v2149_v2 = vld [vmem:[#allocation2 + $0x94] ss:$8 sps:$4 sm:$0xff]   ;;  %v349_v16 = vlaneseq }
  0x73   : > { %792 = vmatprep.subr.bf16.mxu0 %v2076_v18  ;;  %v2151_v3 = vld [vmem:[#allocation2 + $0x90] ss:$8 sps:$4 sm:$0xff]   ;;  %v2152_v4 = vld [vmem:[#allocation2 + $0xa4] ss:$8 sps:$4 sm:$0xff]   ;;  %v2154_v5 = vld [vmem:[#allocation2 + $0xa0] ss:$8 sps:$4 sm:$0xff]  }
  0x74   : > { %v2155_v6 = vld [vmem:[#allocation2 + $0xb4] ss:$8 sps:$4 sm:$0xff]   ;;  %v2157_v7 = vld [vmem:[#allocation2 + $0xb0] ss:$8 sps:$4 sm:$0xff]   ;;  %v2158_v8 = vld [vmem:[#allocation2 + $0xc4] ss:$8 sps:$4 sm:$0xff]  }
  0x75   : > { %1874 = vmatpush3.bf16.msra.mxu1 %v2107_v29  ;;  %v2160_v9 = vld [vmem:[#allocation2 + $0xc0] ss:$8 sps:$4 sm:$0xff]   ;;  %v2161_v10 = vld [vmem:[#allocation2 + $0xd4] ss:$8 sps:$4 sm:$0xff]   ;;  %v2163_v11 = vld [vmem:[#allocation2 + $0xd0] ss:$8 sps:$4 sm:$0xff]  }
  0x76   : > { %793 = vmatpush1.bf16.msra.mxu0 %v2078_v20  ;;  %1875 = vmatprep.subr.bf16.mxu1 %v2109_v30  ;;  %v2164_v12 = vld [vmem:[#allocation2 + $0xe4] ss:$8 sps:$4 sm:$0xff]   ;;  %v2166_v13 = vld [vmem:[#allocation2 + $0xe0] ss:$8 sps:$4 sm:$0xff]   ;;  %v2167_v14 = vld [vmem:[#allocation2 + $0xf4] ss:$8 sps:$4 sm:$0xff]  }
  0x77   : > { %794 = vmatprep.subr.bf16.mxu0 %v2080_v23  ;;  %v2169_v15 = vld [vmem:[#allocation2 + $0xf0] ss:$8 sps:$4 sm:$0xff]   ;;  %s2838_s21 = smov (!%p244_p10, %s243_s21), 5  ;;  %v350_v17 = vshrl.u32 %v349_v16, 7  ;;  %s1862_s27 = smul.u32 192, %s2306_s15 }
  0x78   : > { %s246_s30 = scalar_lea.vmem %s2804_s2, %s2838_s21  ;;  %s1535_s8 = sshll.u32 %s2582_s29, 4  ;;  %s2751_s8 = int_to_ptr.vmem [resolvable:$true] %s1535_s8 }
  0x79   : > { %1876 = vmatpush3.bf16.msra.mxu1 %v2112_v32  ;;  %v359_v18 = vsub.s32 2, %v350_v17  ;;  %v347_v19 = vld [vmem:[%s246_s30] sm:$0x7]  ;;  %s2749_s22 = scalar_lea.hbm %s2805_s3, %s1862_s27  ;;  %s1519_s15 = scalar_lea.sflag [#allocation4], %s2512_s9 }
  0x7a   : > { %795 = vmatpush1.bf16.msra.mxu0 %v2083_v24  ;;  %1877 = vmatprep.subr.bf16.mxu1 %v2114_v34  ;;  %s2228_s6 = scalar_lea.vmem %s2751_s8, 6144  ;;  %p2827_p13 = scmp.ne.s32.totalorder %s2815_s24, 0 }
  0x7b   : > { %796 = vmatprep.subr.bf16.mxu0 %v2085_v27  ;;  %v2576_v21 = vrot.slane %v347_v19, %v359_v18  ;;  %p2229_p11 = scmp.ne.s32.totalorder %s2751_s8, %s2228_s6  ;;  %s2323_s7 = smov [#allocation7]  }
  0x7c   : > { %s2232_s10 = sshll.u32 %s2323_s7, 4  ;;  %s2233_s10 = int_to_ptr.vmem [resolvable:$false] %s2232_s10 }
  0x7d   : > { %1878 = vmatpush3.bf16.msra.mxu1 %v2117_v37  ;;  %p2230_p5 = pnand %p2229_p11, %p2827_p13  ;;  %s2234_s11 = scalar_lea.vmem %s2233_s10, 12288 }
  0x7e   : > { %797 = vmatpush1.bf16.msra.mxu0 %v2088_v28  ;;  %p2235_p3 = scmp.lt.s32.totalorder %s2751_s8, %s2233_s10  ;;  %p2236_p7 = scmp.lt.s32.totalorder %s2234_s11, %s2228_s6 }
  0x7f   : > { %798 = vmatprep.subr.bf16.mxu0 %v2090_v31  ;;  %p2231_p1 = pneg %p2230_p5 }
  0x80   : > { %1006 = vmatmul.mubr.bf16.vlgmr.msra.gmra.mrb[0].mxu1 %v2119_v40  ;;  %p2237_p8 = por %p2236_p7, %p2235_p3 }
  0x81   : > { %1013 = vmatprep.mubr.bf16.mxu1 %v2125_v41 }
  0x82   : > { %799 = vmatpush1.bf16.msra.mxu0 %v2093_v33  ;;  %p2238_p0 = pnand %p2237_p8, %p2231_p1 }
  0x83   : > { %800 = vmatprep.subr.bf16.mxu0 %v2095_v35 }
  0x86   : > { %801 = vmatpush1.bf16.msra.mxu0 %v2098_v38  ;;  %v351_v38 = vsub.s32 0, %v350_v17 }
  0x87   : > { %802 = vmatprep.subr.bf16.mxu0 %v2100_v39 }
  0x88   : > { %1014 = vmatmul.mubr.bf16.gmra.mrb[4].mxu1 %v2127_v46 }
  0x89   : > { %1021 = vmatprep.mubr.bf16.mxu1 %v2128_v47 }
  0x8a   : > { %803 = vmatpush1.bf16.msra.mxu0 %v2103_v42 }
  0x8b   : > { %804 = vmatprep.subr.bf16.mxu0 %v2105_v43 }
  0x8e   : > { %805 = vmatpush1.bf16.msra.mxu0 %v2108_v44 }
  0x8f   : > { %806 = vmatprep.subr.bf16.mxu0 %v2110_v45  ;;  %v2589_v45 = vrot.slane %v347_v19, %v351_v38 }
  0x90   : > { %1022 = vmatmul.mubr.bf16.gmra.mrb[8].mxu1 %v2130_v52 }
  0x91   : > { %1029 = vmatprep.mubr.bf16.mxu1 %v2131_v53 }
  0x92   : > { %807 = vmatpush1.bf16.msra.mxu0 %v2113_v48 }
  0x93   : > { %808 = vmatprep.subr.bf16.mxu0 %v2115_v49 }
  0x96   : > { %809 = vmatpush1.bf16.msra.mxu0 %v2118_v50 }
  0x97   : > { %810 = vmatprep.subr.bf16.mxu0 %v2122_v51 }
  0x98   : > { %1030 = vmatmul.mubr.bf16.gmra.mrb[12].mxu1 %v2133_v55 }
  0x99   : > { %1037 = vmatprep.mubr.bf16.mxu1 %v2134_v56 }
  0x9a   : > { %811 = vmatpush1.bf16.msra.mxu0 %v2124_v54 }
  0x9d   : > { %813 = vmatmul.mubr.bf16.vlgmr.msra.gmra.mrb[0].mxu0 %v2119_v40 }
  0x9e   : > { %822 = vmatprep.mubr.bf16.mxu0 %v2125_v41  ;;  %v355_v41 = vsub.s32 1, %v350_v17 }
  0xa0   : > { %1038 = vmatmul.mubr.bf16.gmra.mrb[16].mxu1 %v2136_v57  ;;  %v2592_v48 = vrot.slane %v347_v19, %v355_v41 }
  0xa1   : > { %1045 = vmatprep.mubr.bf16.mxu1 %v2137_v58 }
  0xa5   : > { %823 = vmatmul.mubr.bf16.gmra.mrb[4].mxu0 %v2127_v46 }
  0xa6   : > { %832 = vmatprep.mubr.bf16.mxu0 %v2128_v47 }
  0xa8   : > { %1046 = vmatmul.mubr.bf16.gmra.mrb[20].mxu1 %v2139_v59 }
  0xa9   : > { %1053 = vmatprep.mubr.bf16.mxu1 %v2140_v60 }
  0xad   : > { %833 = vmatmul.mubr.bf16.gmra.mrb[8].mxu0 %v2130_v52 }
  0xae   : > { %842 = vmatprep.mubr.bf16.mxu0 %v2131_v53 }
  0xb0   : > { %1054 = vmatmul.mubr.bf16.gmra.mrb[24].mxu1 %v2142_v61 }
  0xb1   : > { %1061 = vmatprep.mubr.bf16.mxu1 %v2143_v62 }
  0xb5   : > { %843 = vmatmul.mubr.bf16.gmra.mrb[12].mxu0 %v2133_v55 }
  0xb6   : > { %852 = vmatprep.mubr.bf16.mxu0 %v2134_v56 }
  0xb8   : > { %1062 = vmatmul.mubr.bf16.gmra.mrb[28].mxu1 %v2145_v63 }
  0xb9   : > { %1069 = vmatprep.mubr.bf16.mxu1 %v2146_v0 }
  0xbd   : > { %853 = vmatmul.mubr.bf16.gmra.mrb[16].mxu0 %v2136_v57 }
  0xbe   : > { %862 = vmatprep.mubr.bf16.mxu0 %v2137_v58 }
  0xc0   : > { %1070 = vmatmul.mubr.bf16.gmra.mrb[32].mxu1 %v2148_v1 }
  0xc1   : > { %1077 = vmatprep.mubr.bf16.mxu1 %v2149_v2 }
  0xc5   : > { %863 = vmatmul.mubr.bf16.gmra.mrb[20].mxu0 %v2139_v59 }
  0xc6   : > { %872 = vmatprep.mubr.bf16.mxu0 %v2140_v60 }
  0xc8   : > { %1078 = vmatmul.mubr.bf16.gmra.mrb[36].mxu1 %v2151_v3 }
  0xc9   : > { %1085 = vmatprep.mubr.bf16.mxu1 %v2152_v4 }
  0xcd   : > { %873 = vmatmul.mubr.bf16.gmra.mrb[24].mxu0 %v2142_v61 }
  0xce   : > { %882 = vmatprep.mubr.bf16.mxu0 %v2143_v62 }
  0xd0   : > { %1086 = vmatmul.mubr.bf16.gmra.mrb[40].mxu1 %v2154_v5 }
  0xd1   : > { %1093 = vmatprep.mubr.bf16.mxu1 %v2155_v6 }
  0xd5   : > { %883 = vmatmul.mubr.bf16.gmra.mrb[28].mxu0 %v2145_v63 }
  0xd6   : > { %892 = vmatprep.mubr.bf16.mxu0 %v2146_v0 }
  0xd8   : > { %1094 = vmatmul.mubr.bf16.gmra.mrb[44].mxu1 %v2157_v7 }
  0xd9   : > { %1101 = vmatprep.mubr.bf16.mxu1 %v2158_v8 }
  0xdd   : > { %893 = vmatmul.mubr.bf16.gmra.mrb[32].mxu0 %v2148_v1 }
  0xde   : > { %902 = vmatprep.mubr.bf16.mxu0 %v2149_v2 }
  0xe0   : > { %1102 = vmatmul.mubr.bf16.gmra.mrb[48].mxu1 %v2160_v9 }
  0xe1   : > { %1109 = vmatprep.mubr.bf16.mxu1 %v2161_v10 }
  0xe5   : > { %903 = vmatmul.mubr.bf16.gmra.mrb[36].mxu0 %v2151_v3 }
  0xe6   : > { %912 = vmatprep.mubr.bf16.mxu0 %v2152_v4 }
  0xe8   : > { %1110 = vmatmul.mubr.bf16.gmra.mrb[52].mxu1 %v2163_v11 }
  0xe9   : > { %1117 = vmatprep.mubr.bf16.mxu1 %v2164_v12 }
  0xed   : > { %913 = vmatmul.mubr.bf16.gmra.mrb[40].mxu0 %v2154_v5 }
  0xee   : > { %922 = vmatprep.mubr.bf16.mxu0 %v2155_v6 }
  0xf0   : > { %1118 = vmatmul.mubr.bf16.gmra.mrb[56].mxu1 %v2166_v13 }
  0xf1   : > { %1125 = vmatprep.mubr.bf16.mxu1 %v2167_v14 }
  0xf5   : > { %923 = vmatmul.mubr.bf16.gmra.mrb[44].mxu0 %v2157_v7 }
  0xf6   : > { %932 = vmatprep.mubr.bf16.mxu0 %v2158_v8 }
  0xf8   : > { %1126 = vmatmul.mubr.bf16.gmra.mrb[60].mxu1 %v2169_v15 }
  0xfd   : > { %933 = vmatmul.mubr.bf16.gmra.mrb[48].mxu0 %v2160_v9 }
  0xfe   : > { %942 = vmatprep.mubr.bf16.mxu0 %v2161_v10 }
 0x105   : > { %943 = vmatmul.mubr.bf16.gmra.mrb[52].mxu0 %v2163_v11 }
 0x106   : > { %952 = vmatprep.mubr.bf16.mxu0 %v2164_v12 }
 0x10d   : > { %953 = vmatmul.mubr.bf16.gmra.mrb[56].mxu0 %v2166_v13 }
 0x10e   : > { %962 = vmatprep.mubr.bf16.mxu0 %v2167_v14 }
 0x115   : > { %963 = vmatmul.mubr.bf16.gmra.mrb[60].mxu0 %v2169_v15 }
 0x153   : > { %v1879_v20 = vpop.f32.mrb[0].mxu1 }
 0x154   : > { %v1880_v22 = vpop.f32.mrb[1].mxu1 }
 0x155   : > { %v1881_v23 = vadd.f32 %v1880_v22, %v1879_v20  ;;  %v1882_v24 = vpop.f32.mrb[2].mxu1 }
 0x156   : > { %v1883_v25 = vpop.f32.mrb[3].mxu1 }
 0x157   : > { %v1008_v26 = vadd.f32 %v1881_v23, %v2576_v21  ;;  %v1884_v27 = vadd.f32 %v1883_v25, %v1882_v24 }
 0x159   : > { %v1799_v28 = vpack.c.bf16 %v1008_v26, %v1008_v26  ;;  %v1011_v29 = vadd.f32 %v1884_v27, %v2576_v21 }
 0x15b   : > { %1455 = vst [vmem:[%s2582_s29 + $0x8] sm:$0xf] %v1799_v28  ;;  %v1801_v30 = vpack.c.bf16 %v1011_v29, %v1011_v29  ;;  %v1885_v31 = vpop.f32.mrb[4].mxu1 }
 0x15c   : > { %v1886_v32 = vpop.f32.mrb[5].mxu1 }
 0x15d   : > { %1457 = vst [vmem:[%s2582_s29 + $0x14] sm:$0xf] %v1801_v30  ;;  %v1887_v33 = vadd.f32 %v1886_v32, %v1885_v31  ;;  %v1888_v34 = vpop.f32.mrb[6].mxu1 }
 0x15e   : > { %v1889_v35 = vpop.f32.mrb[7].mxu1 }
 0x15f   : > { %v1016_v36 = vadd.f32 %v1887_v33, %v2576_v21  ;;  %v1890_v37 = vadd.f32 %v1889_v35, %v1888_v34 }
 0x161   : > { %v1803_v39 = vpack.c.bf16 %v1016_v36, %v1016_v36  ;;  %v1019_v40 = vadd.f32 %v1890_v37, %v2576_v21 }
 0x163   : > { %1459 = vst [vmem:[%s2582_s29 + $0x20] sm:$0xf] %v1803_v39  ;;  %v1805_v42 = vpack.c.bf16 %v1019_v40, %v1019_v40  ;;  %v1891_v43 = vpop.f32.mrb[8].mxu1 }
 0x164   : > { %v1892_v44 = vpop.f32.mrb[9].mxu1 }
 0x165   : > { %1461 = vst [vmem:[%s2582_s29 + $0x2c] sm:$0xf] %v1805_v42  ;;  %v1893_v46 = vadd.f32 %v1892_v44, %v1891_v43  ;;  %v1894_v47 = vpop.f32.mrb[10].mxu1 }
 0x166   : > { %v1895_v49 = vpop.f32.mrb[11].mxu1 }
 0x167   : > { %v1024_v50 = vadd.f32 %v1893_v46, %v2576_v21  ;;  %v1896_v51 = vadd.f32 %v1895_v49, %v1894_v47 }
 0x169   : > { %v1807_v55 = vpack.c.bf16 %v1024_v50, %v1024_v50  ;;  %v1027_v56 = vadd.f32 %v1896_v51, %v2576_v21 }
 0x16b   : > { %1463 = vst [vmem:[%s2582_s29 + $0x38] sm:$0xf] %v1807_v55  ;;  %v1809_v61 = vpack.c.bf16 %v1027_v56, %v1027_v56  ;;  %v1897_v62 = vpop.f32.mrb[12].mxu1 }
 0x16c   : > { %v1898_v1 = vpop.f32.mrb[13].mxu1 }
 0x16d   : > { %1465 = vst [vmem:[%s2582_s29 + $0x44] sm:$0xf] %v1809_v61  ;;  %v1899_v2 = vadd.f32 %v1898_v1, %v1897_v62  ;;  %v1900_v3 = vpop.f32.mrb[14].mxu1 }
 0x16e   : > { %v1901_v5 = vpop.f32.mrb[15].mxu1 }
 0x16f   : > { %v1032_v6 = vadd.f32 %v1899_v2, %v2576_v21  ;;  %v1902_v7 = vadd.f32 %v1901_v5, %v1900_v3 }
 0x170   : > { %v814_v52 = vpop.f32.mrb[0].mxu0 }
 0x171   : > { %v815_v53 = vadd.f32 %v814_v52, %v2589_v45  ;;  %v816_v54 = vpop.f32.mrb[1].mxu0  ;;  %v1811_v11 = vpack.c.bf16 %v1032_v6, %v1032_v6  ;;  %v1035_v12 = vadd.f32 %v1902_v7, %v2576_v21 }
 0x172   : > { %v817_v57 = vadd.f32 %v816_v54, %v2592_v48  ;;  %v818_v58 = vpop.f32.mrb[2].mxu0 }
 0x173   : > { %v819_v59 = vadd.f32 %v818_v58, %v2589_v45  ;;  %v820_v60 = vpop.f32.mrb[3].mxu0  ;;  %1467 = vst [vmem:[%s2582_s29 + $0x50] sm:$0xf] %v1811_v11  ;;  %v1813_v17 = vpack.c.bf16 %v1035_v12, %v1035_v12  ;;  %v1903_v18 = vpop.f32.mrb[16].mxu1 }
 0x174   : > { %v1798_v63 = vpack.c.bf16 %v817_v57, %v815_v53  ;;  %v821_v0 = vadd.f32 %v820_v60, %v2592_v48  ;;  %v1904_v22 = vpop.f32.mrb[17].mxu1 }
 0x175   : > { %1469 = vst [vmem:[%s2582_s29 + $0x5c] sm:$0xf] %v1813_v17  ;;  %v1905_v23 = vadd.f32 %v1904_v22, %v1903_v18  ;;  %v1906_v24 = vpop.f32.mrb[18].mxu1 }
 0x176   : > { %1454 = vst [vmem:[%s2582_s29] sm:$0xff] %v1798_v63  ;;  %v1800_v4 = vpack.c.bf16 %v821_v0, %v819_v59  ;;  %v1907_v26 = vpop.f32.mrb[19].mxu1 }
 0x177   : > { %v1040_v27 = vadd.f32 %v1905_v23, %v2576_v21  ;;  %v1908_v28 = vadd.f32 %v1907_v26, %v1906_v24 }
 0x178   : > { %1456 = vst [vmem:[%s2582_s29 + $0xc] sm:$0xff] %v1800_v4  ;;  %v824_v8 = vpop.f32.mrb[4].mxu0 }
 0x179   : > { %v825_v9 = vadd.f32 %v824_v8, %v2589_v45  ;;  %v826_v10 = vpop.f32.mrb[5].mxu0  ;;  %v1815_v32 = vpack.c.bf16 %v1040_v27, %v1040_v27  ;;  %v1043_v33 = vadd.f32 %v1908_v28, %v2576_v21 }
 0x17a   : > { %v827_v13 = vadd.f32 %v826_v10, %v2592_v48  ;;  %v828_v14 = vpop.f32.mrb[6].mxu0 }
 0x17b   : > { %v829_v15 = vadd.f32 %v828_v14, %v2589_v45  ;;  %v830_v16 = vpop.f32.mrb[7].mxu0  ;;  %1471 = vst [vmem:[%s2582_s29 + $0x68] sm:$0xf] %v1815_v32  ;;  %v1817_v38 = vpack.c.bf16 %v1043_v33, %v1043_v33  ;;  %v1909_v39 = vpop.f32.mrb[20].mxu1 }
 0x17c   : > { %v1802_v19 = vpack.c.bf16 %v827_v13, %v825_v9  ;;  %v831_v20 = vadd.f32 %v830_v16, %v2592_v48  ;;  %v1910_v42 = vpop.f32.mrb[21].mxu1 }
 0x17d   : > { %1473 = vst [vmem:[%s2582_s29 + $0x74] sm:$0xf] %v1817_v38  ;;  %v1911_v43 = vadd.f32 %v1910_v42, %v1909_v39  ;;  %v1912_v44 = vpop.f32.mrb[22].mxu1 }
 0x17e   : > { %1458 = vst [vmem:[%s2582_s29 + $0x18] sm:$0xff] %v1802_v19  ;;  %v1804_v25 = vpack.c.bf16 %v831_v20, %v829_v15  ;;  %v1913_v47 = vpop.f32.mrb[23].mxu1 }
 0x17f   : > { %v1048_v49 = vadd.f32 %v1911_v43, %v2576_v21  ;;  %v1914_v50 = vadd.f32 %v1913_v47, %v1912_v44 }
 0x180   : > { %1460 = vst [vmem:[%s2582_s29 + $0x24] sm:$0xff] %v1804_v25  ;;  %v834_v29 = vpop.f32.mrb[8].mxu0 }
 0x181   : > { %v835_v30 = vadd.f32 %v834_v29, %v2589_v45  ;;  %v836_v31 = vpop.f32.mrb[9].mxu0  ;;  %v1819_v54 = vpack.c.bf16 %v1048_v49, %v1048_v49  ;;  %v1051_v55 = vadd.f32 %v1914_v50, %v2576_v21 }
 0x182   : > { %v837_v34 = vadd.f32 %v836_v31, %v2592_v48  ;;  %v838_v35 = vpop.f32.mrb[10].mxu0 }
 0x183   : > { %v839_v36 = vadd.f32 %v838_v35, %v2589_v45  ;;  %v840_v37 = vpop.f32.mrb[11].mxu0  ;;  %1475 = vst [vmem:[%s2582_s29 + $0x80] sm:$0xf] %v1819_v54  ;;  %v1821_v60 = vpack.c.bf16 %v1051_v55, %v1051_v55  ;;  %v1915_v61 = vpop.f32.mrb[24].mxu1 }
 0x184   : > { %v1806_v40 = vpack.c.bf16 %v837_v34, %v835_v30  ;;  %v841_v41 = vadd.f32 %v840_v37, %v2592_v48  ;;  %v1916_v0 = vpop.f32.mrb[25].mxu1 }
 0x185   : > { %1477 = vst [vmem:[%s2582_s29 + $0x8c] sm:$0xf] %v1821_v60  ;;  %v1917_v1 = vadd.f32 %v1916_v0, %v1915_v61  ;;  %v1918_v2 = vpop.f32.mrb[26].mxu1 }
 0x186   : > { %1462 = vst [vmem:[%s2582_s29 + $0x30] sm:$0xff] %v1806_v40  ;;  %v1808_v46 = vpack.c.bf16 %v841_v41, %v839_v36  ;;  %v1919_v4 = vpop.f32.mrb[27].mxu1 }
 0x187   : > { %v1056_v5 = vadd.f32 %v1917_v1, %v2576_v21  ;;  %v1920_v6 = vadd.f32 %v1919_v4, %v1918_v2 }
 0x188   : > { %1464 = vst [vmem:[%s2582_s29 + $0x3c] sm:$0xff] %v1808_v46  ;;  %v844_v51 = vpop.f32.mrb[12].mxu0 }
 0x189   : > { %v845_v52 = vadd.f32 %v844_v51, %v2589_v45  ;;  %v846_v53 = vpop.f32.mrb[13].mxu0  ;;  %v1823_v10 = vpack.c.bf16 %v1056_v5, %v1056_v5  ;;  %v1059_v11 = vadd.f32 %v1920_v6, %v2576_v21 }
 0x18a   : > { %v847_v56 = vadd.f32 %v846_v53, %v2592_v48  ;;  %v848_v57 = vpop.f32.mrb[14].mxu0 }
 0x18b   : > { %v849_v58 = vadd.f32 %v848_v57, %v2589_v45  ;;  %v850_v59 = vpop.f32.mrb[15].mxu0  ;;  %1479 = vst [vmem:[%s2582_s29 + $0x98] sm:$0xf] %v1823_v10  ;;  %v1825_v16 = vpack.c.bf16 %v1059_v11, %v1059_v11  ;;  %v1921_v17 = vpop.f32.mrb[28].mxu1 }
 0x18c   : > { %v1810_v62 = vpack.c.bf16 %v847_v56, %v845_v52  ;;  %v851_v63 = vadd.f32 %v850_v59, %v2592_v48  ;;  %v1922_v20 = vpop.f32.mrb[29].mxu1 }
 0x18d   : > { %1481 = vst [vmem:[%s2582_s29 + $0xa4] sm:$0xf] %v1825_v16  ;;  %v1923_v22 = vadd.f32 %v1922_v20, %v1921_v17  ;;  %v1924_v23 = vpop.f32.mrb[30].mxu1 }
 0x18e   : > { %1466 = vst [vmem:[%s2582_s29 + $0x48] sm:$0xff] %v1810_v62  ;;  %v1812_v3 = vpack.c.bf16 %v851_v63, %v849_v58  ;;  %v1925_v25 = vpop.f32.mrb[31].mxu1 }
 0x18f   : > { %v1064_v26 = vadd.f32 %v1923_v22, %v2576_v21  ;;  %v1926_v27 = vadd.f32 %v1925_v25, %v1924_v23 }
 0x190   : > { %1468 = vst [vmem:[%s2582_s29 + $0x54] sm:$0xff] %v1812_v3  ;;  %v854_v7 = vpop.f32.mrb[16].mxu0 }
 0x191   : > { %v855_v8 = vadd.f32 %v854_v7, %v2589_v45  ;;  %v856_v9 = vpop.f32.mrb[17].mxu0  ;;  %v1827_v31 = vpack.c.bf16 %v1064_v26, %v1064_v26  ;;  %v1067_v32 = vadd.f32 %v1926_v27, %v2576_v21 }
 0x192   : > { %v857_v12 = vadd.f32 %v856_v9, %v2592_v48  ;;  %v858_v13 = vpop.f32.mrb[18].mxu0 }
 0x193   : > { %v859_v14 = vadd.f32 %v858_v13, %v2589_v45  ;;  %v860_v15 = vpop.f32.mrb[19].mxu0  ;;  %1483 = vst [vmem:[%s2582_s29 + $0xb0] sm:$0xf] %v1827_v31  ;;  %v1829_v37 = vpack.c.bf16 %v1067_v32, %v1067_v32  ;;  %v1927_v38 = vpop.f32.mrb[32].mxu1 }
 0x194   : > { %v1814_v18 = vpack.c.bf16 %v857_v12, %v855_v8  ;;  %v861_v19 = vadd.f32 %v860_v15, %v2592_v48  ;;  %v1928_v41 = vpop.f32.mrb[33].mxu1 }
 0x195   : > { %1485 = vst [vmem:[%s2582_s29 + $0xbc] sm:$0xf] %v1829_v37  ;;  %v1929_v42 = vadd.f32 %v1928_v41, %v1927_v38  ;;  %v1930_v43 = vpop.f32.mrb[34].mxu1 }
 0x196   : > { %1470 = vst [vmem:[%s2582_s29 + $0x60] sm:$0xff] %v1814_v18  ;;  %v1816_v24 = vpack.c.bf16 %v861_v19, %v859_v14  ;;  %v1931_v46 = vpop.f32.mrb[35].mxu1 }
 0x197   : > { %v1072_v47 = vadd.f32 %v1929_v42, %v2576_v21  ;;  %v1932_v49 = vadd.f32 %v1931_v46, %v1930_v43 }
 0x198   : > { %1472 = vst [vmem:[%s2582_s29 + $0x6c] sm:$0xff] %v1816_v24  ;;  %v864_v28 = vpop.f32.mrb[20].mxu0 }
 0x199   : > { %v865_v29 = vadd.f32 %v864_v28, %v2589_v45  ;;  %v866_v30 = vpop.f32.mrb[21].mxu0  ;;  %v1831_v53 = vpack.c.bf16 %v1072_v47, %v1072_v47  ;;  %v1075_v54 = vadd.f32 %v1932_v49, %v2576_v21 }
 0x19a   : > { %v867_v33 = vadd.f32 %v866_v30, %v2592_v48  ;;  %v868_v34 = vpop.f32.mrb[22].mxu0 }
 0x19b   : > { %v869_v35 = vadd.f32 %v868_v34, %v2589_v45  ;;  %v870_v36 = vpop.f32.mrb[23].mxu0  ;;  %1487 = vst [vmem:[%s2582_s29 + $0xc8] sm:$0xf] %v1831_v53  ;;  %v1833_v59 = vpack.c.bf16 %v1075_v54, %v1075_v54  ;;  %v1933_v60 = vpop.f32.mrb[36].mxu1 }
 0x19c   : > { %v1818_v39 = vpack.c.bf16 %v867_v33, %v865_v29  ;;  %v871_v40 = vadd.f32 %v870_v36, %v2592_v48  ;;  %v1934_v63 = vpop.f32.mrb[37].mxu1 }
 0x19d   : > { %1489 = vst [vmem:[%s2582_s29 + $0xd4] sm:$0xf] %v1833_v59  ;;  %v1935_v0 = vadd.f32 %v1934_v63, %v1933_v60  ;;  %v1936_v1 = vpop.f32.mrb[38].mxu1 }
 0x19e   : > { %1474 = vst [vmem:[%s2582_s29 + $0x78] sm:$0xff] %v1818_v39  ;;  %v1820_v44 = vpack.c.bf16 %v871_v40, %v869_v35  ;;  %v1937_v3 = vpop.f32.mrb[39].mxu1 }
 0x19f   : > { %v1080_v4 = vadd.f32 %v1935_v0, %v2576_v21  ;;  %v1938_v5 = vadd.f32 %v1937_v3, %v1936_v1 }
 0x1a0   : > { %1476 = vst [vmem:[%s2582_s29 + $0x84] sm:$0xff] %v1820_v44  ;;  %v874_v50 = vpop.f32.mrb[24].mxu0 }
 0x1a1   : > { %v875_v51 = vadd.f32 %v874_v50, %v2589_v45  ;;  %v876_v52 = vpop.f32.mrb[25].mxu0  ;;  %v1835_v9 = vpack.c.bf16 %v1080_v4, %v1080_v4  ;;  %v1083_v10 = vadd.f32 %v1938_v5, %v2576_v21 }
 0x1a2   : > { %v877_v55 = vadd.f32 %v876_v52, %v2592_v48  ;;  %v878_v56 = vpop.f32.mrb[26].mxu0 }
 0x1a3   : > { %v879_v57 = vadd.f32 %v878_v56, %v2589_v45  ;;  %v880_v58 = vpop.f32.mrb[27].mxu0  ;;  %1491 = vst [vmem:[%s2582_s29 + $0xe0] sm:$0xf] %v1835_v9  ;;  %v1837_v15 = vpack.c.bf16 %v1083_v10, %v1083_v10  ;;  %v1939_v16 = vpop.f32.mrb[40].mxu1 }
 0x1a4   : > { %v1822_v61 = vpack.c.bf16 %v877_v55, %v875_v51  ;;  %v881_v62 = vadd.f32 %v880_v58, %v2592_v48  ;;  %v1940_v19 = vpop.f32.mrb[41].mxu1 }
 0x1a5   : > { %1493 = vst [vmem:[%s2582_s29 + $0xec] sm:$0xf] %v1837_v15  ;;  %v1941_v20 = vadd.f32 %v1940_v19, %v1939_v16  ;;  %v1942_v22 = vpop.f32.mrb[42].mxu1 }
 0x1a6   : > { %1478 = vst [vmem:[%s2582_s29 + $0x90] sm:$0xff] %v1822_v61  ;;  %v1824_v2 = vpack.c.bf16 %v881_v62, %v879_v57  ;;  %v1943_v24 = vpop.f32.mrb[43].mxu1 }
 0x1a7   : > { %v1088_v25 = vadd.f32 %v1941_v20, %v2576_v21  ;;  %v1944_v26 = vadd.f32 %v1943_v24, %v1942_v22 }
 0x1a8   : > { %1480 = vst [vmem:[%s2582_s29 + $0x9c] sm:$0xff] %v1824_v2  ;;  %v884_v6 = vpop.f32.mrb[28].mxu0 }
 0x1a9   : > { %v885_v7 = vadd.f32 %v884_v6, %v2589_v45  ;;  %v886_v8 = vpop.f32.mrb[29].mxu0  ;;  %v1839_v30 = vpack.c.bf16 %v1088_v25, %v1088_v25  ;;  %v1091_v31 = vadd.f32 %v1944_v26, %v2576_v21 }
 0x1aa   : > { %v887_v11 = vadd.f32 %v886_v8, %v2592_v48  ;;  %v888_v12 = vpop.f32.mrb[30].mxu0 }
 0x1ab   : > { %v889_v13 = vadd.f32 %v888_v12, %v2589_v45  ;;  %v890_v14 = vpop.f32.mrb[31].mxu0  ;;  %1495 = vst [vmem:[%s2582_s29 + $0xf8] sm:$0xf] %v1839_v30  ;;  %v1841_v36 = vpack.c.bf16 %v1091_v31, %v1091_v31  ;;  %v1945_v37 = vpop.f32.mrb[44].mxu1 }
 0x1ac   : > { %v1826_v17 = vpack.c.bf16 %v887_v11, %v885_v7  ;;  %v891_v18 = vadd.f32 %v890_v14, %v2592_v48  ;;  %v1946_v40 = vpop.f32.mrb[45].mxu1 }
 0x1ad   : > { %1497 = vst [vmem:[%s2582_s29 + $0x104] sm:$0xf] %v1841_v36  ;;  %v1947_v41 = vadd.f32 %v1946_v40, %v1945_v37  ;;  %v1948_v42 = vpop.f32.mrb[46].mxu1 }
 0x1ae   : > { %1482 = vst [vmem:[%s2582_s29 + $0xa8] sm:$0xff] %v1826_v17  ;;  %v1828_v23 = vpack.c.bf16 %v891_v18, %v889_v13  ;;  %v1949_v44 = vpop.f32.mrb[47].mxu1 }
 0x1af   : > { %v1096_v46 = vadd.f32 %v1947_v41, %v2576_v21  ;;  %v1950_v47 = vadd.f32 %v1949_v44, %v1948_v42 }
 0x1b0   : > { %1484 = vst [vmem:[%s2582_s29 + $0xb4] sm:$0xff] %v1828_v23  ;;  %v894_v27 = vpop.f32.mrb[32].mxu0 }
 0x1b1   : > { %v895_v28 = vadd.f32 %v894_v27, %v2589_v45  ;;  %v896_v29 = vpop.f32.mrb[33].mxu0  ;;  %v1843_v52 = vpack.c.bf16 %v1096_v46, %v1096_v46  ;;  %v1099_v53 = vadd.f32 %v1950_v47, %v2576_v21 }
 0x1b2   : > { %v897_v32 = vadd.f32 %v896_v29, %v2592_v48  ;;  %v898_v33 = vpop.f32.mrb[34].mxu0 }
 0x1b3   : > { %v899_v34 = vadd.f32 %v898_v33, %v2589_v45  ;;  %v900_v35 = vpop.f32.mrb[35].mxu0  ;;  %1499 = vst [vmem:[%s2582_s29 + $0x110] sm:$0xf] %v1843_v52  ;;  %v1845_v58 = vpack.c.bf16 %v1099_v53, %v1099_v53  ;;  %v1951_v59 = vpop.f32.mrb[48].mxu1 }
 0x1b4   : > { %v1830_v38 = vpack.c.bf16 %v897_v32, %v895_v28  ;;  %v901_v39 = vadd.f32 %v900_v35, %v2592_v48  ;;  %v1952_v62 = vpop.f32.mrb[49].mxu1 }
 0x1b5   : > { %1501 = vst [vmem:[%s2582_s29 + $0x11c] sm:$0xf] %v1845_v58  ;;  %v1953_v63 = vadd.f32 %v1952_v62, %v1951_v59  ;;  %v1954_v0 = vpop.f32.mrb[50].mxu1 }
 0x1b6   : > { %1486 = vst [vmem:[%s2582_s29 + $0xc0] sm:$0xff] %v1830_v38  ;;  %v1832_v43 = vpack.c.bf16 %v901_v39, %v899_v34  ;;  %v1955_v2 = vpop.f32.mrb[51].mxu1 }
 0x1b7   : > { %v1104_v3 = vadd.f32 %v1953_v63, %v2576_v21  ;;  %v1956_v4 = vadd.f32 %v1955_v2, %v1954_v0 }
 0x1b8   : > { %1488 = vst [vmem:[%s2582_s29 + $0xcc] sm:$0xff] %v1832_v43  ;;  %v904_v49 = vpop.f32.mrb[36].mxu0 }
 0x1b9   : > { %v905_v50 = vadd.f32 %v904_v49, %v2589_v45  ;;  %v906_v51 = vpop.f32.mrb[37].mxu0  ;;  %v1847_v8 = vpack.c.bf16 %v1104_v3, %v1104_v3  ;;  %v1107_v9 = vadd.f32 %v1956_v4, %v2576_v21 }
 0x1ba   : > { %v907_v54 = vadd.f32 %v906_v51, %v2592_v48  ;;  %v908_v55 = vpop.f32.mrb[38].mxu0 }
 0x1bb   : > { %v909_v56 = vadd.f32 %v908_v55, %v2589_v45  ;;  %v910_v57 = vpop.f32.mrb[39].mxu0  ;;  %1503 = vst [vmem:[%s2582_s29 + $0x128] sm:$0xf] %v1847_v8  ;;  %v1849_v14 = vpack.c.bf16 %v1107_v9, %v1107_v9  ;;  %v1957_v15 = vpop.f32.mrb[52].mxu1 }
 0x1bc   : > { %v1834_v60 = vpack.c.bf16 %v907_v54, %v905_v50  ;;  %v911_v61 = vadd.f32 %v910_v57, %v2592_v48  ;;  %v1958_v18 = vpop.f32.mrb[53].mxu1 }
 0x1bd   : > { %1505 = vst [vmem:[%s2582_s29 + $0x134] sm:$0xf] %v1849_v14  ;;  %v1959_v19 = vadd.f32 %v1958_v18, %v1957_v15  ;;  %v1960_v20 = vpop.f32.mrb[54].mxu1 }
 0x1be   : > { %1490 = vst [vmem:[%s2582_s29 + $0xd8] sm:$0xff] %v1834_v60  ;;  %v1836_v1 = vpack.c.bf16 %v911_v61, %v909_v56  ;;  %v1961_v23 = vpop.f32.mrb[55].mxu1 }
 0x1bf   : > { %v1112_v24 = vadd.f32 %v1959_v19, %v2576_v21  ;;  %v1962_v25 = vadd.f32 %v1961_v23, %v1960_v20 }
 0x1c0   : > { %1492 = vst [vmem:[%s2582_s29 + $0xe4] sm:$0xff] %v1836_v1  ;;  %v914_v5 = vpop.f32.mrb[40].mxu0 }
 0x1c1   : > { %v915_v6 = vadd.f32 %v914_v5, %v2589_v45  ;;  %v916_v7 = vpop.f32.mrb[41].mxu0  ;;  %v1851_v29 = vpack.c.bf16 %v1112_v24, %v1112_v24  ;;  %v1115_v30 = vadd.f32 %v1962_v25, %v2576_v21 }
 0x1c2   : > { %v917_v10 = vadd.f32 %v916_v7, %v2592_v48  ;;  %v918_v11 = vpop.f32.mrb[42].mxu0 }
 0x1c3   : > { %v919_v12 = vadd.f32 %v918_v11, %v2589_v45  ;;  %v920_v13 = vpop.f32.mrb[43].mxu0  ;;  %1507 = vst [vmem:[%s2582_s29 + $0x140] sm:$0xf] %v1851_v29  ;;  %v1853_v35 = vpack.c.bf16 %v1115_v30, %v1115_v30  ;;  %v1963_v36 = vpop.f32.mrb[56].mxu1 }
 0x1c4   : > { %v1838_v16 = vpack.c.bf16 %v917_v10, %v915_v6  ;;  %v921_v17 = vadd.f32 %v920_v13, %v2592_v48  ;;  %v1964_v39 = vpop.f32.mrb[57].mxu1 }
 0x1c5   : > { %1509 = vst [vmem:[%s2582_s29 + $0x14c] sm:$0xf] %v1853_v35  ;;  %v1965_v40 = vadd.f32 %v1964_v39, %v1963_v36  ;;  %v1966_v41 = vpop.f32.mrb[58].mxu1 }
 0x1c6   : > { %1494 = vst [vmem:[%s2582_s29 + $0xf0] sm:$0xff] %v1838_v16  ;;  %v1840_v22 = vpack.c.bf16 %v921_v17, %v919_v12  ;;  %v1967_v43 = vpop.f32.mrb[59].mxu1 }
 0x1c7   : > { %v1120_v44 = vadd.f32 %v1965_v40, %v2576_v21  ;;  %v1968_v46 = vadd.f32 %v1967_v43, %v1966_v41 }
 0x1c8   : > { %1496 = vst [vmem:[%s2582_s29 + $0xfc] sm:$0xff] %v1840_v22  ;;  %v924_v26 = vpop.f32.mrb[44].mxu0 }
 0x1c9   : > { %v925_v27 = vadd.f32 %v924_v26, %v2589_v45  ;;  %v926_v28 = vpop.f32.mrb[45].mxu0  ;;  %v1855_v51 = vpack.c.bf16 %v1120_v44, %v1120_v44  ;;  %v1123_v52 = vadd.f32 %v1968_v46, %v2576_v21 }
 0x1ca   : > { %v927_v31 = vadd.f32 %v926_v28, %v2592_v48  ;;  %v928_v32 = vpop.f32.mrb[46].mxu0 }
 0x1cb   : > { %v929_v33 = vadd.f32 %v928_v32, %v2589_v45  ;;  %v930_v34 = vpop.f32.mrb[47].mxu0  ;;  %1511 = vst [vmem:[%s2582_s29 + $0x158] sm:$0xf] %v1855_v51  ;;  %v1857_v57 = vpack.c.bf16 %v1123_v52, %v1123_v52  ;;  %v1969_v58 = vpop.f32.mrb[60].mxu1 }
 0x1cc   : > { %v1842_v37 = vpack.c.bf16 %v927_v31, %v925_v27  ;;  %v931_v38 = vadd.f32 %v930_v34, %v2592_v48  ;;  %v1970_v61 = vpop.f32.mrb[61].mxu1 }
 0x1cd   : > { %1513 = vst [vmem:[%s2582_s29 + $0x164] sm:$0xf] %v1857_v57  ;;  %v1971_v62 = vadd.f32 %v1970_v61, %v1969_v58  ;;  %v1972_v63 = vpop.f32.mrb[62].mxu1 }
 0x1ce   : > { %1498 = vst [vmem:[%s2582_s29 + $0x108] sm:$0xff] %v1842_v37  ;;  %v1844_v42 = vpack.c.bf16 %v931_v38, %v929_v33  ;;  %v1973_v1 = vpop.f32.mrb[63].mxu1 }
 0x1cf   : > { %v1128_v2 = vadd.f32 %v1971_v62, %v2576_v21  ;;  %v1974_v3 = vadd.f32 %v1973_v1, %v1972_v63 }
 0x1d0   : > { %1500 = vst [vmem:[%s2582_s29 + $0x114] sm:$0xff] %v1844_v42  ;;  %v934_v47 = vpop.f32.mrb[48].mxu0 }
 0x1d1   : > { %v935_v49 = vadd.f32 %v934_v47, %v2589_v45  ;;  %v936_v50 = vpop.f32.mrb[49].mxu0  ;;  %v1859_v7 = vpack.c.bf16 %v1128_v2, %v1128_v2  ;;  %v1131_v8 = vadd.f32 %v1974_v3, %v2576_v21 }
 0x1d2   : > { %v937_v53 = vadd.f32 %v936_v50, %v2592_v48  ;;  %v938_v54 = vpop.f32.mrb[50].mxu0 }
 0x1d3   : > { %v939_v55 = vadd.f32 %v938_v54, %v2589_v45  ;;  %v940_v56 = vpop.f32.mrb[51].mxu0  ;;  %1515 = vst [vmem:[%s2582_s29 + $0x170] sm:$0xf] %v1859_v7  ;;  %v1861_v13 = vpack.c.bf16 %v1131_v8, %v1131_v8 }
 0x1d4   : > { %v1846_v59 = vpack.c.bf16 %v937_v53, %v935_v49  ;;  %v941_v60 = vadd.f32 %v940_v56, %v2592_v48 }
 0x1d5   : > { %1517 = vst [vmem:[%s2582_s29 + $0x17c] sm:$0xf] %v1861_v13 }
 0x1d6   : > { %1502 = vst [vmem:[%s2582_s29 + $0x120] sm:$0xff] %v1846_v59  ;;  %v1848_v0 = vpack.c.bf16 %v941_v60, %v939_v55 }
 0x1d8   : > { %1504 = vst [vmem:[%s2582_s29 + $0x12c] sm:$0xff] %v1848_v0  ;;  %v944_v4 = vpop.f32.mrb[52].mxu0 }
 0x1d9   : > { %v945_v5 = vadd.f32 %v944_v4, %v2589_v45  ;;  %v946_v6 = vpop.f32.mrb[53].mxu0 }
 0x1da   : > { %v947_v9 = vadd.f32 %v946_v6, %v2592_v48  ;;  %v948_v10 = vpop.f32.mrb[54].mxu0 }
 0x1db   : > { %v949_v11 = vadd.f32 %v948_v10, %v2589_v45  ;;  %v950_v12 = vpop.f32.mrb[55].mxu0 }
 0x1dc   : > { %v1850_v14 = vpack.c.bf16 %v947_v9, %v945_v5  ;;  %v951_v15 = vadd.f32 %v950_v12, %v2592_v48 }
 0x1de   : > { %1506 = vst [vmem:[%s2582_s29 + $0x138] sm:$0xff] %v1850_v14  ;;  %v1852_v16 = vpack.c.bf16 %v951_v15, %v949_v11 }
 0x1e0   : > { %1508 = vst [vmem:[%s2582_s29 + $0x144] sm:$0xff] %v1852_v16  ;;  %v954_v17 = vpop.f32.mrb[56].mxu0 }
 0x1e1   : > { %v955_v21 = vadd.f32 %v954_v17, %v2589_v45  ;;  %v956_v18 = vpop.f32.mrb[57].mxu0 }
 0x1e2   : > { %v957_v19 = vadd.f32 %v956_v18, %v2592_v48  ;;  %v958_v20 = vpop.f32.mrb[58].mxu0 }
 0x1e3   : > { %v959_v22 = vadd.f32 %v958_v20, %v2589_v45  ;;  %v960_v23 = vpop.f32.mrb[59].mxu0 }
 0x1e4   : > { %v1854_v24 = vpack.c.bf16 %v957_v19, %v955_v21  ;;  %v961_v25 = vadd.f32 %v960_v23, %v2592_v48 }
 0x1e6   : > { %1510 = vst [vmem:[%s2582_s29 + $0x150] sm:$0xff] %v1854_v24  ;;  %v1856_v26 = vpack.c.bf16 %v961_v25, %v959_v22 }
 0x1e8   : > { %1512 = vst [vmem:[%s2582_s29 + $0x15c] sm:$0xff] %v1856_v26  ;;  %v964_v27 = vpop.f32.mrb[60].mxu0 }
 0x1e9   : > { %v965_v28 = vadd.f32 %v964_v27, %v2589_v45  ;;  %v966_v29 = vpop.f32.mrb[61].mxu0 }
 0x1ea   : > { %v967_v30 = vadd.f32 %v966_v29, %v2592_v48  ;;  %v968_v31 = vpop.f32.mrb[62].mxu0 }
 0x1eb   : > { %v969_v32 = vadd.f32 %v968_v31, %v2589_v45  ;;  %v970_v33 = vpop.f32.mrb[63].mxu0 }
 0x1ec   : > { %v1858_v34 = vpack.c.bf16 %v967_v30, %v965_v28  ;;  %v971_v35 = vadd.f32 %v970_v33, %v2592_v48 }
 0x1ee   : > { %1514 = vst [vmem:[%s2582_s29 + $0x168] sm:$0xff] %v1858_v34  ;;  %v1860_v36 = vpack.c.bf16 %v971_v35, %v969_v32 }
 0x1f0   : > { %1516 = vst [vmem:[%s2582_s29 + $0x174] sm:$0xff] %v1860_v36 }
 0x1f1   : > { %2241 = shalt.err (!%p2238_p0)
}
 0x1f2   : > { %s2242_s18 = scalar_lea.hbm %s2749_s22, 6144  ;;  %s2246_s23 = scalar_lea.hbm %s2805_s3, 12288 }
 0x1f3   : > { %p2243_p4 = scmp.ne.s32.totalorder %s2749_s22, %s2242_s18  ;;  %p2247_p2 = scmp.lt.u32.totalorder %s2749_s22, %s2805_s3 }
 0x1f4   : > { %p2248_p9 = scmp.lt.u32.totalorder %s2246_s23, %s2242_s18  ;;  %p2250_p11 = scmp.lt.u32.totalorder %s2242_s18, %s2749_s22 }
 0x1f5   : > { %p2244_p6 = pnand %p2243_p4, %p2827_p13 }
 0x1f6   : > { %p2249_p10 = por %p2248_p9, %p2247_p2 }
 0x1f7   : > { %p2245_p12 = pneg %p2244_p6 }
 0x1f8   : > { %p2251_p5 = por %p2250_p11, %p2249_p10 }
 0x1fa   : > { %p2252_p1 = pnand %p2251_p5, %p2245_p12 }
 0x1fc   : > { %2255 = shalt.err (!%p2252_p1)
}
 0x1fd   : > { %s2324_s29 = smov 192   ;;  %s2325_s27 = smov 384  }
 0x1fe   : > { %s2326_s19 = smov 12  }
 0x1ff   : > { %1983 = dma.vmem_to_hbm [thread:$0]  (%p2827_p13), %s2751_s8, 6144, %s2749_s22, %s1519_s15, %s2324_s29, %s2325_s27, %s2326_s19  }
 0x200 PF: > { %s1550_s28 = sand.u32 1, %s2294_s12   ;;  %p2828_p3 = scmp.ne.s32.totalorder %s2816_s25, 0 }
 0x201   : > { %p2829_p7 = scmp.ge.s32.totalorder %s2314_s17, 2  ;;  %s1551_s6 = scalar_lea.sflag [#allocation4], %s1550_s28 }
 0x203   : > { %p1994_p8 = pnand %p2829_p7, %p2828_p3 }
 0x205   : > { %2289 = dma.done.wait (!%p1994_p8), %s1551_s6, 6144  }
 0x206   : > { %2291 = vsyncadd (!%p1994_p8), %s1551_s6, 4294961152  ;;  %s20_s17 = sadd.s32 1, %s2314_s17   ;;  %s2830_s12 = smov %s2298_s13 }
 0x207   : > { %p17_p0 = scmp.ge.s32.totalorder %s20_s17, 4   ;;  %s2831_s13 = smov %s2302_s14 }
 0x208   : > { %s2832_s14 = smov %s2473_s5  ;;  %s2833_s15 = smov %s2310_s16 }
 0x209   : > { %s2834_s16 = smov %s2836_s4  ;;  %19 = sbr.rel (!%p17_p0) target bundleno = 7 (0x7), region = 86 }
 0x210   :  { %1556 = vsyncpa [#allocation3], 1 }
 0x211   :  { %1558 = vsyncpa [#allocation3 + $0x1], 1 }
 0x212   :  { %1559 = vsyncpa [#allocation6], 1 }
 0x213   :  { %1561 = vsyncpa [#allocation6 + $0x1], 1 }
 0x214   :  { %1562 = vsyncpa [#allocation4], 1 }
 0x215   :  { %1564 = vsyncpa [#allocation4 + $0x1], 1 }

</bundles_post_ra>
